<compile_context>
chip_gen: v5e
topology: v5e:2x2
jax: 0.10.0
libtpu: 0.0.40
codegen_flags: <defaults>
</compile_context>

<pallas_src>
import functools
import math

import jax
import jax.numpy as jnp
from jax.experimental import pallas as pl
from jax.experimental.pallas import tpu as pltpu

_LANE = 128
_SUBLANE = 8


def _round_up(x, m):
    return ((x + m - 1) // m) * m


def _mlp_kernel(*refs, num_layers, activate_output):
    """Fused MLP body.

    refs = (x_ref, w0, b0, w1, b1, ..., w_{L-1}, b_{L-1}, o_ref)
    x_ref: (tile_b, K0); w_l: (K_l, N_l) pre-transposed; b_l: (1, N_l).
    The running activation stays in VMEM/vregs across all layers.
    """
    x_ref = refs[0]
    o_ref = refs[-1]
    h = x_ref[...]
    for i in range(num_layers):
        w = refs[1 + 2 * i][...]
        b = refs[2 + 2 * i][...]
        h = jnp.dot(h, w, preferred_element_type=jnp.float32) + b
        if i != num_layers - 1 or activate_output:
            h = jnp.maximum(h, 0.0)
    o_ref[...] = h.astype(o_ref.dtype)


def mlp_forward(x, layers, *, activate_output=False, tile_b=None):
    """Run the whole MLP in a single fused Pallas kernel.

    x:      [B, K0] float32
    layers: list of (weight [in, out], bias [out]) with weights pre-transposed.
    """
    B, K0 = x.shape
    num_layers = len(layers)
    assert layers[0][0].shape[0] == K0

    # --- pad final layer so the single HBM output store is lane-dense (x128) ---
    n_out = layers[-1][0].shape[1]
    n_pad = _round_up(n_out, _LANE)
    layers = list(layers)
    if n_pad != n_out:
        w_last, b_last = layers[-1]
        w_last = jnp.pad(w_last, ((0, 0), (0, n_pad - n_out)))
        b_last = jnp.pad(b_last, (0, n_pad - n_out))
        layers[-1] = (w_last, b_last)

    # --- batch tile selection -------------------------------------------------
    if tile_b is None:
        widths = [K0] + [w.shape[1] for (w, _) in layers]
        weight_bytes = sum(w.size + b.size for (w, b) in layers) * 4

        def footprint(tb):
            # double-buffered x / out tiles + resident weights + activation temp
            act = tb * (2 * K0 + 2 * n_pad + 2 * max(widths)) * 4
            return act + weight_bytes

        budget = 24 * 1024 * 1024  # headroom under the 32 MiB scoped VMEM default
        tile_b = min(_round_up(B, _SUBLANE), 512)
        tile_b = max(_SUBLANE, (tile_b // _SUBLANE) * _SUBLANE)
        while tile_b > _SUBLANE and footprint(tile_b) > budget:
            tile_b = max(_SUBLANE, ((tile_b // 2) // _SUBLANE) * _SUBLANE)

    grid = (pl.cdiv(B, tile_b),)

    # --- specs ------------------------------------------------------------------
    in_specs = [pl.BlockSpec((tile_b, K0), lambda i: (i, 0))]
    flat_params = []
    for (w, b) in layers:
        k, n = w.shape
        in_specs.append(pl.BlockSpec((k, n), lambda i: (0, 0)))   # resident weight
        in_specs.append(pl.BlockSpec((1, n), lambda i: (0, 0)))   # resident bias
        flat_params.append(w)
        flat_params.append(b.reshape(1, n))

    kernel = functools.partial(
        _mlp_kernel, num_layers=num_layers, activate_output=activate_output)

    out = pl.pallas_call(
        kernel,
        out_shape=jax.ShapeDtypeStruct((B, n_pad), x.dtype),
        grid_spec=pltpu.PrefetchScalarGridSpec(
            num_scalar_prefetch=0,
            grid=grid,
            in_specs=in_specs,
            out_specs=pl.BlockSpec((tile_b, n_pad), lambda i: (i, 0)),
        ),
        compiler_params=pltpu.CompilerParams(
            dimension_semantics=("parallel",)),
    )(x, *flat_params)

    if n_pad != n_out:
        out = out[:, :n_out]  # glue: drop lane-padding columns
    return out


def init_linear_params(key, in_features, out_features):
    """Init mimicking torch.nn.Linear default (uniform +-1/sqrt(fan_in)).

    Weight is stored PRE-TRANSPOSED as [in, out] so the kernel does x @ W + b
    with no per-forward transpose.
    """
    kw, kb = jax.random.split(key)
    bound = 1.0 / math.sqrt(in_features)
    weight_t = jax.random.uniform(
        kw, (in_features, out_features), jnp.float32, -bound, bound)
    bias = jax.random.uniform(kb, (out_features,), jnp.float32, -bound, bound)
    return weight_t, bias


class MLP:
    """Pallas port of raylab MLP (activation fixed to ReLU)."""

    def __init__(self, in_features, out_features, hidden_features,
                 state_features=None, num_blocks=2, activate_output=False,
                 key=None):
        if key is None:
            key = jax.random.PRNGKey(0)
        self.stateful = bool(state_features)
        self.activate_output = activate_output
        first_in = in_features + (state_features if self.stateful else 0)

        # layer dims: first_in -> hidden, (hidden -> hidden) x num_blocks, hidden -> out
        dims = [first_in] + [hidden_features] * (num_blocks + 1) + [out_features]
        keys = jax.random.split(key, len(dims) - 1)
        self.layers = [
            init_linear_params(keys[i], dims[i], dims[i + 1])
            for i in range(len(dims) - 1)
        ]

    def __call__(self, inputs, params=None, *, tile_b=None):
        if self.stateful:
            if params is None:
                raise ValueError("Parameters required for stateful mlp.")
            x = jnp.concatenate([inputs, params["state"]], axis=-1)  # glue
        else:
            x = inputs
        return mlp_forward(x, self.layers,
                           activate_output=self.activate_output, tile_b=tile_b)


def mlp_reference(layers, x, activate_output):
    """Pure-JAX reference of the same forward pass (weights already [in, out])."""
    n = len(layers)
    for idx, (w, b) in enumerate(layers):
        x = x @ w + b
        if idx != n - 1 or activate_output:
            x = jnp.maximum(x, 0.0)
    return x


if __name__ == "__main__":
    key = jax.random.PRNGKey(0)
    k_x, k_x2, k_p = jax.random.split(key, 3)

    batch = 8
    in_features = 16
    hidden_features = 32
    out_features = 8

    mlp = MLP(in_features, out_features, hidden_features,
              num_blocks=2, activate_output=False, key=k_p)

    # single-tile case (small batch)
    x = jax.random.normal(k_x, (batch, in_features), jnp.float32)
    out = jax.block_until_ready(mlp(x))
    ref = mlp_reference(mlp.layers, x, activate_output=False)
    assert out.shape == (batch, out_features)
    assert jnp.allclose(out, ref, atol=1e-5, rtol=1e-5)

    # multi-tile case: exercise the batch grid / pipelining path
    x2 = jax.random.normal(k_x2, (64, in_features), jnp.float32)
    out2 = jax.block_until_ready(mlp(x2, tile_b=16))
    ref2 = mlp_reference(mlp.layers, x2, activate_output=False)
    assert out2.shape == (64, out_features)
    assert jnp.allclose(out2, ref2, atol=1e-5, rtol=1e-5)

    print("KERNEL_OK")
</pallas_src>

<mosaic_0001>
module attributes {stable_mosaic.version = 11 : i64} {
  func.func @_mlp_kernel(%arg0: i32, %arg1: memref<8x16xf32, #tpu.memory_space<vmem>>, %arg2: memref<16x32xf32, #tpu.memory_space<vmem>>, %arg3: memref<1x32xf32, #tpu.memory_space<vmem>>, %arg4: memref<32x32xf32, #tpu.memory_space<vmem>>, %arg5: memref<1x32xf32, #tpu.memory_space<vmem>>, %arg6: memref<32x32xf32, #tpu.memory_space<vmem>>, %arg7: memref<1x32xf32, #tpu.memory_space<vmem>>, %arg8: memref<32x128xf32, #tpu.memory_space<vmem>>, %arg9: memref<1x128xf32, #tpu.memory_space<vmem>>, %arg10: memref<8x128xf32, #tpu.memory_space<vmem>>) attributes {dimension_semantics = [#tpu.dimension_semantics<parallel>], iteration_bounds = array<i64: 1>, scalar_prefetch = 0 : i64, scratch_operands = 0 : i64, tpu.core_type = #tpu.core_type<tc>, window_params = [{transform_indices = @transform_0, window_bounds = array<i64: 8, 16>}, {pipeline_mode = #tpu.pipeline_mode<synchronous>, transform_indices = @transform_1, window_bounds = array<i64: 16, 32>}, {pipeline_mode = #tpu.pipeline_mode<synchronous>, transform_indices = @transform_2, window_bounds = array<i64: 1, 32>}, {pipeline_mode = #tpu.pipeline_mode<synchronous>, transform_indices = @transform_3, window_bounds = array<i64: 32, 32>}, {pipeline_mode = #tpu.pipeline_mode<synchronous>, transform_indices = @transform_4, window_bounds = array<i64: 1, 32>}, {pipeline_mode = #tpu.pipeline_mode<synchronous>, transform_indices = @transform_5, window_bounds = array<i64: 32, 32>}, {pipeline_mode = #tpu.pipeline_mode<synchronous>, transform_indices = @transform_6, window_bounds = array<i64: 1, 32>}, {pipeline_mode = #tpu.pipeline_mode<synchronous>, transform_indices = @transform_7, window_bounds = array<i64: 32, 128>}, {pipeline_mode = #tpu.pipeline_mode<synchronous>, transform_indices = @transform_8, window_bounds = array<i64: 1, 128>}, {transform_indices = @transform_9, window_bounds = array<i64: 8, 128>}]} {
    %c0 = arith.constant 0 : index
    %c0_0 = arith.constant 0 : index
    %0 = vector.load %arg1[%c0, %c0_0] : memref<8x16xf32, #tpu.memory_space<vmem>>, vector<8x16xf32>
    %c0_1 = arith.constant 0 : index
    %c0_2 = arith.constant 0 : index
    %1 = vector.load %arg2[%c0_1, %c0_2] : memref<16x32xf32, #tpu.memory_space<vmem>>, vector<16x32xf32>
    %c0_3 = arith.constant 0 : index
    %c0_4 = arith.constant 0 : index
    %2 = vector.load %arg3[%c0_3, %c0_4] : memref<1x32xf32, #tpu.memory_space<vmem>>, vector<1x32xf32>
    %cst = arith.constant dense<0.000000e+00> : vector<8x32xf32>
    %3 = tpu.matmul %0, %1, %cst {dimension_numbers = #tpu.dot_dimension_numbers<[1], [0], [0], [1], [0, 0, 1, 1], [], []>} : vector<8x16xf32>, vector<16x32xf32>, vector<8x32xf32> -> vector<8x32xf32>
    %4 = vector.broadcast %2 : vector<1x32xf32> to vector<8x32xf32>
    %5 = arith.addf %3, %4 : vector<8x32xf32>
    %cst_5 = arith.constant 0.000000e+00 : f32
    %6 = vector.broadcast %cst_5 : f32 to vector<8x32xf32>
    %7 = arith.maximumf %5, %6 : vector<8x32xf32>
    %c0_6 = arith.constant 0 : index
    %c0_7 = arith.constant 0 : index
    %8 = vector.load %arg4[%c0_6, %c0_7] : memref<32x32xf32, #tpu.memory_space<vmem>>, vector<32x32xf32>
    %c0_8 = arith.constant 0 : index
    %c0_9 = arith.constant 0 : index
    %9 = vector.load %arg5[%c0_8, %c0_9] : memref<1x32xf32, #tpu.memory_space<vmem>>, vector<1x32xf32>
    %cst_10 = arith.constant dense<0.000000e+00> : vector<8x32xf32>
    %10 = tpu.matmul %7, %8, %cst_10 {dimension_numbers = #tpu.dot_dimension_numbers<[1], [0], [0], [1], [0, 0, 1, 1], [], []>} : vector<8x32xf32>, vector<32x32xf32>, vector<8x32xf32> -> vector<8x32xf32>
    %11 = vector.broadcast %9 : vector<1x32xf32> to vector<8x32xf32>
    %12 = arith.addf %10, %11 : vector<8x32xf32>
    %cst_11 = arith.constant 0.000000e+00 : f32
    %13 = vector.broadcast %cst_11 : f32 to vector<8x32xf32>
    %14 = arith.maximumf %12, %13 : vector<8x32xf32>
    %c0_12 = arith.constant 0 : index
    %c0_13 = arith.constant 0 : index
    %15 = vector.load %arg6[%c0_12, %c0_13] : memref<32x32xf32, #tpu.memory_space<vmem>>, vector<32x32xf32>
    %c0_14 = arith.constant 0 : index
    %c0_15 = arith.constant 0 : index
    %16 = vector.load %arg7[%c0_14, %c0_15] : memref<1x32xf32, #tpu.memory_space<vmem>>, vector<1x32xf32>
    %cst_16 = arith.constant dense<0.000000e+00> : vector<8x32xf32>
    %17 = tpu.matmul %14, %15, %cst_16 {dimension_numbers = #tpu.dot_dimension_numbers<[1], [0], [0], [1], [0, 0, 1, 1], [], []>} : vector<8x32xf32>, vector<32x32xf32>, vector<8x32xf32> -> vector<8x32xf32>
    %18 = vector.broadcast %16 : vector<1x32xf32> to vector<8x32xf32>
    %19 = arith.addf %17, %18 : vector<8x32xf32>
    %cst_17 = arith.constant 0.000000e+00 : f32
    %20 = vector.broadcast %cst_17 : f32 to vector<8x32xf32>
    %21 = arith.maximumf %19, %20 : vector<8x32xf32>
    %c0_18 = arith.constant 0 : index
    %c0_19 = arith.constant 0 : index
    %22 = vector.load %arg8[%c0_18, %c0_19] : memref<32x128xf32, #tpu.memory_space<vmem>>, vector<32x128xf32>
    %c0_20 = arith.constant 0 : index
    %c0_21 = arith.constant 0 : index
    %23 = vector.load %arg9[%c0_20, %c0_21] : memref<1x128xf32, #tpu.memory_space<vmem>>, vector<1x128xf32>
    %cst_22 = arith.constant dense<0.000000e+00> : vector<8x128xf32>
    %24 = tpu.matmul %21, %22, %cst_22 {dimension_numbers = #tpu.dot_dimension_numbers<[1], [0], [0], [1], [0, 0, 1, 1], [], []>} : vector<8x32xf32>, vector<32x128xf32>, vector<8x128xf32> -> vector<8x128xf32>
    %25 = vector.broadcast %23 : vector<1x128xf32> to vector<8x128xf32>
    %26 = arith.addf %24, %25 : vector<8x128xf32>
    %c0_23 = arith.constant 0 : index
    %c0_24 = arith.constant 0 : index
    %27 = vector.load %arg10[%c0_23, %c0_24] : memref<8x128xf32, #tpu.memory_space<vmem>>, vector<8x128xf32>
    tpu.vector_store %arg10[%c0_23, %c0_24], %26 {strides = array<i32>} : memref<8x128xf32, #tpu.memory_space<vmem>>, vector<8x128xf32>,
    return
  }
  func.func @transform_0(%arg0: i32) -> (i32, i32) {
    %c0_i32 = arith.constant 0 : i32
    %c0_i32_0 = arith.constant 0 : i32
    return %arg0, %c0_i32 : i32, i32
  }
  func.func @transform_1(%arg0: i32) -> (i32, i32) {
    %c0_i32 = arith.constant 0 : i32
    %c0_i32_0 = arith.constant 0 : i32
    %c0_i32_1 = arith.constant 0 : i32
    return %c0_i32, %c0_i32_0 : i32, i32
  }
  func.func @transform_2(%arg0: i32) -> (i32, i32) {
    %c0_i32 = arith.constant 0 : i32
    %c0_i32_0 = arith.constant 0 : i32
    %c0_i32_1 = arith.constant 0 : i32
    return %c0_i32, %c0_i32_0 : i32, i32
  }
  func.func @transform_3(%arg0: i32) -> (i32, i32) {
    %c0_i32 = arith.constant 0 : i32
    %c0_i32_0 = arith.constant 0 : i32
    %c0_i32_1 = arith.constant 0 : i32
    return %c0_i32, %c0_i32_0 : i32, i32
  }
  func.func @transform_4(%arg0: i32) -> (i32, i32) {
    %c0_i32 = arith.constant 0 : i32
    %c0_i32_0 = arith.constant 0 : i32
    %c0_i32_1 = arith.constant 0 : i32
    return %c0_i32, %c0_i32_0 : i32, i32
  }
  func.func @transform_5(%arg0: i32) -> (i32, i32) {
    %c0_i32 = arith.constant 0 : i32
    %c0_i32_0 = arith.constant 0 : i32
    %c0_i32_1 = arith.constant 0 : i32
    return %c0_i32, %c0_i32_0 : i32, i32
  }
  func.func @transform_6(%arg0: i32) -> (i32, i32) {
    %c0_i32 = arith.constant 0 : i32
    %c0_i32_0 = arith.constant 0 : i32
    %c0_i32_1 = arith.constant 0 : i32
    return %c0_i32, %c0_i32_0 : i32, i32
  }
  func.func @transform_7(%arg0: i32) -> (i32, i32) {
    %c0_i32 = arith.constant 0 : i32
    %c0_i32_0 = arith.constant 0 : i32
    %c0_i32_1 = arith.constant 0 : i32
    return %c0_i32, %c0_i32_0 : i32, i32
  }
  func.func @transform_8(%arg0: i32) -> (i32, i32) {
    %c0_i32 = arith.constant 0 : i32
    %c0_i32_0 = arith.constant 0 : i32
    %c0_i32_1 = arith.constant 0 : i32
    return %c0_i32, %c0_i32_0 : i32, i32
  }
  func.func @transform_9(%arg0: i32) -> (i32, i32) {
    %c0_i32 = arith.constant 0 : i32
    %c0_i32_0 = arith.constant 0 : i32
    return %arg0, %c0_i32 : i32, i32
  }
}

</mosaic_0001>

<bundles_post_ra>
// kernel: tpu_custom_call.1
= control target key start
LH: loop header
LB: loop body
LE: loop exit
PB: predicated region body
PF: predicated region fallthrough
CT: control target
= control target key end

     0   :  { %14 = vsyncpa [#allocation3], 0  ;;  %s516_s0 = inlined_call_operand.hbm [shape: f32[8,16], index: 0, kind: input, shape index: {}]   ;;  %s517_s1 = inlined_call_operand.hbm [shape: f32[16,32], index: 1, kind: input, shape index: {}]   ;;  %s518_s2 = inlined_call_operand.vmem [shape: f32[1,32], index: 2, kind: input, shape index: {}]   ;;  %s519_s3 = inlined_call_operand.hbm [shape: f32[32,32], index: 3, kind: input, shape index: {}]   ;;  %s520_s4 = inlined_call_operand.vmem [shape: f32[1,32], index: 4, kind: input, shape index: {}]   ;;  %s521_s5 = inlined_call_operand.hbm [shape: f32[32,32], index: 5, kind: input, shape index: {}]   ;;  %s522_s6 = inlined_call_operand.vmem [shape: f32[1,32], index: 6, kind: input, shape index: {}]   ;;  %s523_s7 = inlined_call_operand.hbm [shape: f32[32,128], index: 7, kind: input, shape index: {}]   ;;  %s524_s8 = inlined_call_operand.vmem [shape: f32[1,128], index: 8, kind: input, shape index: {}]   ;;  %s525_s9 = inlined_call_operand.hbm [shape: f32[8,128], index: 9, kind: output, shape index: {}]  }
   0x1   :  { %15 = vsyncpa [#allocation6], 0 }
   0x2   :  { %16 = vsyncpa [#allocation9], 0  ;;  %s33_s11 = sshll.u32 %s517_s1, 4  ;;  %s34_s11 = int_to_ptr.hbm [resolvable:$true] %s33_s11 }
   0x3   :  { %17 = vsyncpa [#allocation4], 0  ;;  %s425_s12 = smov [#allocation5]   ;;  %s63_s16 = sshll.u32 %s521_s5, 4  ;;  %s64_s16 = int_to_ptr.hbm [resolvable:$true] %s63_s16 }
   0x4   :  { %s35_s13 = sshll.u32 %s425_s12, 4  ;;  %s426_s17 = smov 128   ;;  %s36_s13 = int_to_ptr.vmem [resolvable:$true] %s35_s13 }
   0x5   :  { %s427_s18 = smov 8   ;;  %s428_s19 = smov [#allocation8]  }
   0x6   :  { %41 = dma.hbm_to_vmem [thread:$0]  %s34_s11, 256, %s36_s13, [#allocation6], %s426_s17, %s426_s17, %s427_s18  }
   0x7   :  { %s65_s20 = sshll.u32 %s428_s19, 4  ;;  %s23_s23 = sshll.u32 %s516_s0, 4  ;;  %s66_s20 = int_to_ptr.vmem [resolvable:$true] %s65_s20  ;;  %s24_s23 = int_to_ptr.hbm [resolvable:$true] %s23_s23 }
   0x8   :  { %71 = dma.hbm_to_vmem [thread:$0]  %s64_s16, 512, %s66_s20, [#allocation9], %s426_s17, %s426_s17, %s427_s18  }
   0x9   :  { %s48_s25 = sshll.u32 %s519_s3, 4  ;;  %s429_s26 = smov [#allocation2]   ;;  %s49_s25 = int_to_ptr.hbm [resolvable:$true] %s48_s25 }
   0xa   :  { %s25_s27 = sshll.u32 %s429_s26, 4  ;;  %s430_s5 = smov [#allocation7]   ;;  %s26_s27 = int_to_ptr.vmem [resolvable:$true] %s25_s27 }
   0xb   :  { %28 = dma.hbm_to_vmem [thread:$0]  %s24_s23, 128, %s26_s27, [#allocation3]  }
   0xc   :  { %s50_s28 = sshll.u32 %s430_s5, 4  ;;  %s78_s10 = sshll.u32 %s523_s7, 4  ;;  %s51_s28 = int_to_ptr.vmem [resolvable:$true] %s50_s28  ;;  %s79_s10 = int_to_ptr.hbm [resolvable:$true] %s78_s10 }
   0xd   :  { %56 = dma.hbm_to_vmem [thread:$0]  %s49_s25, 512, %s51_s28, [#allocation6], %s426_s17, %s426_s17, %s427_s18  }
   0xe   :  { %s431_s0 = smov [#allocation10]  }
   0xf   :  { %s80_s11 = sshll.u32 %s431_s0, 4  ;;  %s81_s11 = int_to_ptr.vmem [resolvable:$true] %s80_s11 }
  0x10   :  { %86 = dma.hbm_to_vmem [thread:$0]  %s79_s10, 512, %s81_s11, [#allocation9], %s426_s17, %s426_s17, %s427_s18  }
  0x11   :  { %417 = dma.done.wait [#allocation3], 128  }
  0x12   :  { %418 = vsyncadd [#allocation3], 4294967168 }
  0x13   :  { %419 = dma.done.wait [#allocation6], 768  }
  0x14   :  { %420 = vsyncadd [#allocation6], 4294966528 }
  0x15   :  { %421 = dma.done.wait [#allocation9], 1024  }
  0x16   :  { %422 = vsyncadd [#allocation9], 4294966272  ;;  %v111_v0 = vld [vmem:[#allocation5 + $0x8] sm:$0xff]  ;;  %v110_v1 = vld [vmem:[#allocation5] sm:$0xff]  ;;  %vm116_vm0 = vcmask 130048   ;;  %vm149_vm1 = vcmask 261120  }
  0x17   :  { %134 = vmatpush.msra.mxu0 %v111_v0  ;;  %v109_v2 = vld [vmem:[#allocation2] sm:$0xff]  ;;  %v144_v3 = vld [vmem:[#allocation7 + $0x18] sm:$0xff]  ;;  %v143_v4 = vld [vmem:[#allocation7 + $0x10] sm:$0xff]  ;;  %s432_s16 = smov [#allocation11]   ;;  %s245_s20 = sshll.u32 %s525_s9, 4  ;;  %s246_s20 = int_to_ptr.hbm [resolvable:$true] %s245_s20 }
  0x18   :  { %165 = vmatpush.msra.mxu1 %v144_v3  ;;  %v142_v5 = vld [vmem:[#allocation7 + $0x8] sm:$0xff]  ;;  %v141_v6 = vld [vmem:[#allocation7] sm:$0xff]  ;;  %v177_v7 = vld [vmem:[#allocation8 + $0x18] sm:$0xff]  ;;  %s243_s17 = sshll.u32 %s432_s16, 4  ;;  %s244_s17 = int_to_ptr.vmem [resolvable:$true] %s243_s17 }
  0x19   :  { %135 = vmatpush.msra.mxu0 %v110_v1  ;;  %197 = vmatpush.msra.mxu2 %v177_v7  ;;  %v269_v8 = vld [vmem:[%s518_s2] ss:$0 sm:$0xff]  ;;  %v176_v12 = vld [vmem:[#allocation8 + $0x10] sm:$0xff]  ;;  %v174_v14 = vld [vmem:[#allocation8] sm:$0xff] }
  0x1a   :  { %257 = vmatmul.msk.f32.vlgmr.msra.gmra.mxu0 %vm116_vm0, %v109_v2  ;;  %166 = vmatpush.msra.mxu1 %v143_v4  ;;  %v175_v13 = vld [vmem:[#allocation8 + $0x8] sm:$0xff]  ;;  %v209_v15 = vld [vmem:[#allocation10 + $0x18] sm:$0xff]  ;;  %v208_v20 = vld [vmem:[#allocation10 + $0x10] sm:$0xff] }
  0x1b   :  { %198 = vmatpush.msra.mxu2 %v176_v12  ;;  %229 = vmatpush.msra.mxu3 %v209_v15  ;;  %v270_v16 = vld [vmem:[%s520_s4] ss:$0 sm:$0xff]  ;;  %v206_v22 = vld [vmem:[#allocation10] sm:$0xff] }
  0x1c   :  { %167 = vmatpush.msra.mxu1 %v142_v5  ;;  %v207_v21 = vld [vmem:[#allocation10 + $0x8] sm:$0xff] }
  0x1d   :  { %199 = vmatpush.msra.mxu2 %v175_v13  ;;  %230 = vmatpush.msra.mxu3 %v208_v20  ;;  %v271_v23 = vld [vmem:[%s522_s6] ss:$0 sm:$0xff] }
  0x1e   :  { %168 = vmatpush.msra.mxu1 %v141_v6  ;;  %v272_v27 = vld [vmem:[%s524_s8] ss:$0 sm:$0xff] }
  0x1f   :  { %200 = vmatpush.msra.mxu2 %v174_v14  ;;  %231 = vmatpush.msra.mxu3 %v207_v21 }
  0x21   :  { %232 = vmatpush.msra.mxu3 %v206_v22 }
  0x97   :  { %v137_v9 = vpop.f32.mrf.mxu0 }
  0x98   :  { %v138_v10 = vadd.f32 %v269_v8, %v137_v9 }
  0x9a   :  { %v140_v11 = vmax.f32 %v138_v10, 0.0 }
  0x9c   :  { %258 = vmatmul.msk.f32.vlgmr.msra.gmra.mxu1 %vm149_vm1, %v140_v11 }
 0x119   :  { %v170_v17 = vpop.f32.mrf.mxu1 }
 0x11a   :  { %v171_v18 = vadd.f32 %v270_v16, %v170_v17 }
 0x11c   :  { %v173_v19 = vmax.f32 %v171_v18, 0.0 }
 0x11e   :  { %259 = vmatmul.msk.f32.vlgmr.msra.gmra.mxu2 %vm149_vm1, %v173_v19 }
 0x1a1   :  { %v202_v24 = vpop.f32.mrf.mxu2 }
 0x1a2   :  { %v203_v25 = vadd.f32 %v271_v23, %v202_v24 }
 0x1a4   :  { %v205_v26 = vmax.f32 %v203_v25, 0.0 }
 0x1a6   :  { %260 = vmatmul.msk.f32.vlgmr.msra.gmra.mxu3 %vm149_vm1, %v205_v26 }
 0x229   :  { %v234_v28 = vpop.f32.mrf.mxu3 }
 0x22a   :  { %v235_v29 = vadd.f32 %v272_v27, %v234_v28 }
 0x22c   :  { %237 = vst [vmem:[#allocation11] sm:$0xff] %v235_v29 }
 0x22d   :  { %248 = dma.vmem_to_hbm [thread:$0]  %s244_s17, 128, %s246_s20, [#allocation4]  }
 0x22e   :  { %423 = dma.done.wait [#allocation4], 128  }
 0x22f   :  { %424 = vsyncadd [#allocation4], 4294967168 }
 0x230   :  { %253 = vsyncpa [#allocation3], 1 }
 0x231   :  { %254 = vsyncpa [#allocation6], 1 }
 0x232   :  { %255 = vsyncpa [#allocation9], 1 }
 0x233   :  { %256 = vsyncpa [#allocation4], 1 }

</bundles_post_ra>
